<compile_context>
chip_gen: v7x
topology: tpu7x:2x2x1
jax: 0.10.0
libtpu: 0.0.40
codegen_flags: <defaults>
</compile_context>

<pallas_src>
import jax
import jax.numpy as jnp
from jax.experimental import pallas as pl
from jax.experimental.pallas import tpu as pltpu

D_IN = 256
D_HID = 128
D_CAT = 4 * D_HID  # dense1 | dense3 | dense4 | dense5 fused along the output axis


def _round_up(a, m):
    return ((a + m - 1) // m) * m


def _pick_batch_tile(B, tile_b):
    # At most `tile_b`; at least 2 tiles when B is large enough (v7x megacore);
    # always an 8-sublane multiple.
    half = _round_up(pl.cdiv(B, 2), 8)
    return max(8, min(tile_b, half))


# ----------------------------------------------------------------------------
# Kernels
# ----------------------------------------------------------------------------
def rgn_cell_kernel(s_ref, x_ref, wcat_ref, bcat_ref, w2_ref, b2_ref, o_ref):
    # Matmul dtype follows the (pre-cast) weights; gate math stays f32.
    x = x_ref[...].astype(wcat_ref.dtype)        # (TB, 256)
    s_t1 = s_ref[...]                            # (TB, 128) f32

    # One fused MXU matmul for all four x-projections: (TB,256) @ (256,512).
    xc = jnp.dot(x, wcat_ref[...], preferred_element_type=jnp.float32) + bcat_ref[...]

    # Aligned 128-lane slices of the fused result.
    r_t = jnp.maximum(xc[:, 0 * D_HID:1 * D_HID], 0.0)     # relu(dense1(x_t))
    i_t = jax.nn.sigmoid(xc[:, 1 * D_HID:2 * D_HID])       # sigmoid(dense3(x_t))
    g_t = jnp.tanh(xc[:, 2 * D_HID:3 * D_HID])             # tanh(dense4(x_t))
    d5 = jnp.maximum(xc[:, 3 * D_HID:4 * D_HID], 0.0)      # relu(dense5(x_t)), bias-free

    # dense2 depends on r_t -> separate small matmul (intentionally untouched).
    m_t = jnp.tanh(
        jnp.dot(r_t.astype(w2_ref.dtype), w2_ref[...],
                preferred_element_type=jnp.float32) + b2_ref[...])

    y_t = jnp.maximum(m_t * s_t1 + i_t * g_t, 0.0)
    # s_t = relu(relu(dense5(x)) + y_t); outer relu is redundant (both args >= 0).
    o_ref[...] = d5 + y_t


def rgn_seq_kernel(s0_ref, x_ref, wcat_ref, bcat_ref, w2_ref, b2_ref, o_ref, s_scr):
    t = pl.program_id(1)

    @pl.when(t == 0)
    def _():
        s_scr[...] = s0_ref[...]

    x = x_ref[0].astype(wcat_ref.dtype)          # (TB, 256)
    s_t1 = s_scr[...]                            # carried state, f32

    xc = jnp.dot(x, wcat_ref[...], preferred_element_type=jnp.float32) + bcat_ref[...]
    r_t = jnp.maximum(xc[:, 0 * D_HID:1 * D_HID], 0.0)
    i_t = jax.nn.sigmoid(xc[:, 1 * D_HID:2 * D_HID])
    g_t = jnp.tanh(xc[:, 2 * D_HID:3 * D_HID])
    d5 = jnp.maximum(xc[:, 3 * D_HID:4 * D_HID], 0.0)

    m_t = jnp.tanh(
        jnp.dot(r_t.astype(w2_ref.dtype), w2_ref[...],
                preferred_element_type=jnp.float32) + b2_ref[...])

    s_t = d5 + jnp.maximum(m_t * s_t1 + i_t * g_t, 0.0)

    s_scr[...] = s_t
    o_ref[0] = s_t


# ----------------------------------------------------------------------------
# Wrappers
# ----------------------------------------------------------------------------
def prepare_params(params, matmul_dtype=jnp.bfloat16):
    """One-time parameter prep: fuse the four x-projections and pick the MXU dtype.

    Call once per model, NOT per step (hoisted out of rgn_cell per perf review).
    """
    wcat = jnp.concatenate(
        [params["w1"], params["w3"], params["w4"], params["w5"]],
        axis=1).astype(matmul_dtype)                                        # (256, 512)
    bcat = jnp.concatenate(
        [params["b1"], params["b3"], params["b4"],
         jnp.zeros((1, D_HID), jnp.float32)], axis=1)                       # (1, 512) f32
    return {
        "wcat": wcat,
        "bcat": bcat,
        "w2": params["w2"].astype(matmul_dtype),
        "b2": params["b2"],
    }


def rgn_cell(s_t1, x_t, prepared, *, tile_b=1024):
    """Single RGNCell step. `prepared` comes from prepare_params()."""
    B = x_t.shape[0]
    tb = _pick_batch_tile(B, tile_b)
    grid = (pl.cdiv(B, tb),)

    wcat, bcat, w2, b2 = prepared["wcat"], prepared["bcat"], prepared["w2"], prepared["b2"]
    wbytes = wcat.size * wcat.dtype.itemsize + w2.size * w2.dtype.itemsize
    flops = 2 * B * (D_IN * D_CAT + D_HID * D_HID)
    transcendentals = 3 * B * D_HID                      # 2x tanh + 1x sigmoid
    bytes_accessed = 4 * B * (D_IN + 2 * D_HID) + wbytes + 4 * (D_CAT + D_HID)

    return pl.pallas_call(
        rgn_cell_kernel,
        out_shape=jax.ShapeDtypeStruct((B, D_HID), jnp.float32),
        grid_spec=pltpu.PrefetchScalarGridSpec(
            num_scalar_prefetch=0,
            grid=grid,
            in_specs=[
                pl.BlockSpec((tb, D_HID), lambda i: (i, 0)),      # s_t1 tile
                pl.BlockSpec((tb, D_IN), lambda i: (i, 0)),       # x_t  tile
                pl.BlockSpec((D_IN, D_CAT), lambda i: (0, 0)),    # fused W (VMEM-resident)
                pl.BlockSpec((1, D_CAT), lambda i: (0, 0)),       # fused bias
                pl.BlockSpec((D_HID, D_HID), lambda i: (0, 0)),   # w2
                pl.BlockSpec((1, D_HID), lambda i: (0, 0)),       # b2
            ],
            out_specs=pl.BlockSpec((tb, D_HID), lambda i: (i, 0)),
        ),
        compiler_params=pltpu.CompilerParams(
            dimension_semantics=("parallel",),          # v7x: split batch tiles over 2 TCs
            vmem_limit_bytes=32 * 1024 * 1024,          # ~5.5 MiB live at tb=1024
        ),
        cost_estimate=pl.CostEstimate(
            flops=flops,
            transcendentals=transcendentals,
            bytes_accessed=bytes_accessed,
        ),
    )(s_t1, x_t, wcat, bcat, w2, b2)


def rgn_cell_sequence(s0, xs, prepared, *, tile_b=1024):
    """Run the cell over a whole sequence inside one kernel.

    xs: (T, B, 256); returns all states (T, B, 128).  The state is carried in a
    VMEM scratch across the trailing 'arbitrary' time axis, so weights are
    DMA'd once and the launch/pipeline cost is amortized over T steps.
    """
    T, B, _ = xs.shape
    tb = _pick_batch_tile(B, tile_b)
    grid = (pl.cdiv(B, tb), T)

    wcat, bcat, w2, b2 = prepared["wcat"], prepared["bcat"], prepared["w2"], prepared["b2"]
    wbytes = wcat.size * wcat.dtype.itemsize + w2.size * w2.dtype.itemsize
    flops = 2 * T * B * (D_IN * D_CAT + D_HID * D_HID)
    transcendentals = 3 * T * B * D_HID
    bytes_accessed = 4 * T * B * (D_IN + D_HID) + 4 * B * D_HID + wbytes + 4 * (D_CAT + D_HID)

    return pl.pallas_call(
        rgn_seq_kernel,
        out_shape=jax.ShapeDtypeStruct((T, B, D_HID), jnp.float32),
        grid_spec=pltpu.PrefetchScalarGridSpec(
            num_scalar_prefetch=0,
            grid=grid,
            in_specs=[
                pl.BlockSpec((tb, D_HID), lambda i, t: (i, 0)),       # s0 tile
                pl.BlockSpec((1, tb, D_IN), lambda i, t: (t, i, 0)),  # x_t tile at step t
                pl.BlockSpec((D_IN, D_CAT), lambda i, t: (0, 0)),     # fused W (resident)
                pl.BlockSpec((1, D_CAT), lambda i, t: (0, 0)),
                pl.BlockSpec((D_HID, D_HID), lambda i, t: (0, 0)),
                pl.BlockSpec((1, D_HID), lambda i, t: (0, 0)),
            ],
            out_specs=pl.BlockSpec((1, tb, D_HID), lambda i, t: (t, i, 0)),
            scratch_shapes=[pltpu.VMEM((tb, D_HID), jnp.float32)],    # carried state
        ),
        compiler_params=pltpu.CompilerParams(
            dimension_semantics=("parallel", "arbitrary"),
            vmem_limit_bytes=32 * 1024 * 1024,
        ),
        cost_estimate=pl.CostEstimate(
            flops=flops,
            transcendentals=transcendentals,
            bytes_accessed=bytes_accessed,
        ),
    )(s0, xs, wcat, bcat, w2, b2)


# ----------------------------------------------------------------------------
# Parameters + pure-JAX references
# ----------------------------------------------------------------------------
def make_params(key):
    """Deterministic synthetic parameters matching RGNCell.__init__ shapes.

    PyTorch stores nn.Linear weight as (out, in); we store the transpose
    (in, out) so the kernel computes x @ W.
    """
    ks = jax.random.split(key, 9)

    def lin_w(k, in_dim, out_dim):
        scale = 1.0 / jnp.sqrt(in_dim)
        return jax.random.uniform(k, (in_dim, out_dim), jnp.float32, -scale, scale)

    def lin_b(k, in_dim, out_dim):
        scale = 1.0 / jnp.sqrt(in_dim)
        return jax.random.uniform(k, (1, out_dim), jnp.float32, -scale, scale)

    return {
        "w1": lin_w(ks[0], 256, 128), "b1": lin_b(ks[1], 256, 128),
        "w2": lin_w(ks[2], 128, 128), "b2": lin_b(ks[3], 128, 128),
        "w3": lin_w(ks[4], 256, 128), "b3": lin_b(ks[5], 256, 128),
        "w4": lin_w(ks[6], 256, 128), "b4": lin_b(ks[7], 256, 128),
        "w5": lin_w(ks[8], 256, 128),  # dense5: bias=False
    }


def rgn_cell_ref(s_t1, x_t, p):
    """Pure-JAX f32 reference (mirrors the PyTorch forward exactly)."""
    r_t = jax.nn.relu(x_t @ p["w1"] + p["b1"])
    m_t = jnp.tanh(r_t @ p["w2"] + p["b2"])
    forget = m_t * s_t1
    i_t = jax.nn.sigmoid(x_t @ p["w3"] + p["b3"])
    g_t = jnp.tanh(x_t @ p["w4"] + p["b4"])
    read = i_t * g_t
    y_t = jax.nn.relu(forget + read)
    return jax.nn.relu(jax.nn.relu(x_t @ p["w5"]) + y_t)


def rgn_sequence_ref(s0, xs, p):
    def step(s, x):
        s_new = rgn_cell_ref(s, x, p)
        return s_new, s_new
    _, ys = jax.lax.scan(step, s0, xs)
    return ys


# ----------------------------------------------------------------------------
# Self-test
# ----------------------------------------------------------------------------
if __name__ == "__main__":
    key = jax.random.PRNGKey(0)
    k_param, k_x, k_s, k_xs = jax.random.split(key, 4)

    params = make_params(k_param)
    prep_bf16 = prepare_params(params)                          # fast default (bf16 MXU)
    prep_f32 = prepare_params(params, matmul_dtype=jnp.float32)  # bit-tight path

    # --- single step, f32 matmuls: exact vs reference ---
    B = 8
    x_t = jax.random.normal(k_x, (B, 256), jnp.float32)
    s_t1 = jax.random.normal(k_s, (B, 128), jnp.float32)
    out_f32 = jax.block_until_ready(rgn_cell(s_t1, x_t, prep_f32))
    ref = rgn_cell_ref(s_t1, x_t, params)
    assert out_f32.shape == (B, 128)
    assert jnp.allclose(out_f32, ref, atol=1e-5, rtol=1e-5), "f32 path mismatch"

    # --- single step, bf16 MXU path; batch not a multiple of the tile
    #     (exercises the partial last block since wrapper-side padding was removed) ---
    B2 = 12
    x2 = jax.random.normal(k_x, (B2, 256), jnp.float32)
    s2 = jax.random.normal(k_s, (B2, 128), jnp.float32)
    out_bf = jax.block_until_ready(rgn_cell(s2, x2, prep_bf16))
    ref2 = rgn_cell_ref(s2, x2, params)
    assert out_bf.shape == (B2, 128)
    assert jnp.allclose(out_bf, ref2, atol=5e-2, rtol=5e-2), "bf16 path mismatch"

    # --- fused multi-timestep (scan-in-kernel) path ---
    T = 6
    xs = jax.random.normal(k_xs, (T, B, 256), jnp.float32)
    seq = jax.block_until_ready(rgn_cell_sequence(s_t1, xs, prep_bf16))
    seq_ref = rgn_sequence_ref(s_t1, xs, params)
    assert seq.shape == (T, B, 128)
    assert jnp.allclose(seq, seq_ref, atol=5e-2, rtol=5e-2), "sequence path mismatch"

    print("KERNEL_OK")
</pallas_src>

<mosaic_0001>
module attributes {stable_mosaic.version = 11 : i64} {
  func.func @rgn_cell_kernel(%arg0: i32, %arg1: memref<8x128xf32, #tpu.memory_space<vmem>>, %arg2: memref<8x256xf32, #tpu.memory_space<vmem>>, %arg3: memref<256x512xf32, #tpu.memory_space<vmem>>, %arg4: memref<1x512xf32, #tpu.memory_space<vmem>>, %arg5: memref<128x128xf32, #tpu.memory_space<vmem>>, %arg6: memref<1x128xf32, #tpu.memory_space<vmem>>, %arg7: memref<8x128xf32, #tpu.memory_space<vmem>>) attributes {dimension_semantics = [#tpu.dimension_semantics<parallel>], iteration_bounds = array<i64: 1>, scalar_prefetch = 0 : i64, scratch_operands = 0 : i64, tpu.core_type = #tpu.core_type<tc>, window_params = [{transform_indices = @transform_0, window_bounds = array<i64: 8, 128>}, {transform_indices = @transform_1, window_bounds = array<i64: 8, 256>}, {pipeline_mode = #tpu.pipeline_mode<synchronous>, transform_indices = @transform_2, window_bounds = array<i64: 256, 512>}, {pipeline_mode = #tpu.pipeline_mode<synchronous>, transform_indices = @transform_3, window_bounds = array<i64: 1, 512>}, {pipeline_mode = #tpu.pipeline_mode<synchronous>, transform_indices = @transform_4, window_bounds = array<i64: 128, 128>}, {pipeline_mode = #tpu.pipeline_mode<synchronous>, transform_indices = @transform_5, window_bounds = array<i64: 1, 128>}, {transform_indices = @transform_6, window_bounds = array<i64: 8, 128>}]} {
    %c0 = arith.constant 0 : index
    %c0_0 = arith.constant 0 : index
    %0 = vector.load %arg2[%c0, %c0_0] : memref<8x256xf32, #tpu.memory_space<vmem>>, vector<8x256xf32>
    %c0_1 = arith.constant 0 : index
    %c0_2 = arith.constant 0 : index
    %1 = vector.load %arg1[%c0_1, %c0_2] : memref<8x128xf32, #tpu.memory_space<vmem>>, vector<8x128xf32>
    %c0_3 = arith.constant 0 : index
    %c0_4 = arith.constant 0 : index
    %2 = vector.load %arg3[%c0_3, %c0_4] : memref<256x512xf32, #tpu.memory_space<vmem>>, vector<256x512xf32>
    %cst = arith.constant dense<0.000000e+00> : vector<8x512xf32>
    %3 = tpu.matmul %0, %2, %cst {dimension_numbers = #tpu.dot_dimension_numbers<[1], [0], [0], [1], [0, 0, 1, 1], [], []>} : vector<8x256xf32>, vector<256x512xf32>, vector<8x512xf32> -> vector<8x512xf32>
    %c0_5 = arith.constant 0 : index
    %c0_6 = arith.constant 0 : index
    %4 = vector.load %arg4[%c0_5, %c0_6] : memref<1x512xf32, #tpu.memory_space<vmem>>, vector<1x512xf32>
    %5 = vector.broadcast %4 : vector<1x512xf32> to vector<8x512xf32>
    %6 = arith.addf %3, %5 : vector<8x512xf32>
    %7 = vector.extract_strided_slice %6 {offsets = [0, 0], sizes = [8, 128], strides = [1, 1]} : vector<8x512xf32> to vector<8x128xf32>
    %cst_7 = arith.constant 0.000000e+00 : f32
    %8 = vector.broadcast %cst_7 : f32 to vector<8x128xf32>
    %9 = arith.maximumf %7, %8 : vector<8x128xf32>
    %10 = vector.extract_strided_slice %6 {offsets = [0, 128], sizes = [8, 128], strides = [1, 1]} : vector<8x512xf32> to vector<8x128xf32>
    %11 = arith.negf %10 : vector<8x128xf32>
    %12 = math.exp %11 : vector<8x128xf32>
    %cst_8 = arith.constant 1.000000e+00 : f32
    %13 = vector.broadcast %cst_8 : f32 to vector<8x128xf32>
    %14 = arith.addf %13, %12 : vector<8x128xf32>
    %15 = arith.divf %13, %14 : vector<8x128xf32>
    %16 = vector.extract_strided_slice %6 {offsets = [0, 256], sizes = [8, 128], strides = [1, 1]} : vector<8x512xf32> to vector<8x128xf32>
    %17 = math.tanh %16 : vector<8x128xf32>
    %18 = vector.extract_strided_slice %6 {offsets = [0, 384], sizes = [8, 128], strides = [1, 1]} : vector<8x512xf32> to vector<8x128xf32>
    %cst_9 = arith.constant 0.000000e+00 : f32
    %19 = vector.broadcast %cst_9 : f32 to vector<8x128xf32>
    %20 = arith.maximumf %18, %19 : vector<8x128xf32>
    %c0_10 = arith.constant 0 : index
    %c0_11 = arith.constant 0 : index
    %21 = vector.load %arg5[%c0_10, %c0_11] : memref<128x128xf32, #tpu.memory_space<vmem>>, vector<128x128xf32>
    %cst_12 = arith.constant dense<0.000000e+00> : vector<8x128xf32>
    %22 = tpu.matmul %9, %21, %cst_12 {dimension_numbers = #tpu.dot_dimension_numbers<[1], [0], [0], [1], [0, 0, 1, 1], [], []>} : vector<8x128xf32>, vector<128x128xf32>, vector<8x128xf32> -> vector<8x128xf32>
    %c0_13 = arith.constant 0 : index
    %c0_14 = arith.constant 0 : index
    %23 = vector.load %arg6[%c0_13, %c0_14] : memref<1x128xf32, #tpu.memory_space<vmem>>, vector<1x128xf32>
    %24 = vector.broadcast %23 : vector<1x128xf32> to vector<8x128xf32>
    %25 = arith.addf %22, %24 : vector<8x128xf32>
    %26 = math.tanh %25 : vector<8x128xf32>
    %27 = arith.mulf %26, %1 : vector<8x128xf32>
    %28 = arith.mulf %15, %17 : vector<8x128xf32>
    %29 = arith.addf %27, %28 : vector<8x128xf32>
    %cst_15 = arith.constant 0.000000e+00 : f32
    %30 = vector.broadcast %cst_15 : f32 to vector<8x128xf32>
    %31 = arith.maximumf %29, %30 : vector<8x128xf32>
    %32 = arith.addf %20, %31 : vector<8x128xf32>
    %c0_16 = arith.constant 0 : index
    %c0_17 = arith.constant 0 : index
    %33 = vector.load %arg7[%c0_16, %c0_17] : memref<8x128xf32, #tpu.memory_space<vmem>>, vector<8x128xf32>
    tpu.vector_store %arg7[%c0_16, %c0_17], %32 {strides = array<i32>} : memref<8x128xf32, #tpu.memory_space<vmem>>, vector<8x128xf32>,
    return
  }
  func.func @transform_0(%arg0: i32) -> (i32, i32) {
    %c0_i32 = arith.constant 0 : i32
    %c0_i32_0 = arith.constant 0 : i32
    return %arg0, %c0_i32 : i32, i32
  }
  func.func @transform_1(%arg0: i32) -> (i32, i32) {
    %c0_i32 = arith.constant 0 : i32
    %c0_i32_0 = arith.constant 0 : i32
    return %arg0, %c0_i32 : i32, i32
  }
  func.func @transform_2(%arg0: i32) -> (i32, i32) {
    %c0_i32 = arith.constant 0 : i32
    %c0_i32_0 = arith.constant 0 : i32
    %c0_i32_1 = arith.constant 0 : i32
    return %c0_i32, %c0_i32_0 : i32, i32
  }
  func.func @transform_3(%arg0: i32) -> (i32, i32) {
    %c0_i32 = arith.constant 0 : i32
    %c0_i32_0 = arith.constant 0 : i32
    %c0_i32_1 = arith.constant 0 : i32
    return %c0_i32, %c0_i32_0 : i32, i32
  }
  func.func @transform_4(%arg0: i32) -> (i32, i32) {
    %c0_i32 = arith.constant 0 : i32
    %c0_i32_0 = arith.constant 0 : i32
    %c0_i32_1 = arith.constant 0 : i32
    return %c0_i32, %c0_i32_0 : i32, i32
  }
  func.func @transform_5(%arg0: i32) -> (i32, i32) {
    %c0_i32 = arith.constant 0 : i32
    %c0_i32_0 = arith.constant 0 : i32
    %c0_i32_1 = arith.constant 0 : i32
    return %c0_i32, %c0_i32_0 : i32, i32
  }
  func.func @transform_6(%arg0: i32) -> (i32, i32) {
    %c0_i32 = arith.constant 0 : i32
    %c0_i32_0 = arith.constant 0 : i32
    return %arg0, %c0_i32 : i32, i32
  }
}

</mosaic_0001>

<bundles_post_ra>
// kernel: tpu_custom_call.1
= control target key start
LH: loop header
LB: loop body
LE: loop exit
PB: predicated region body
PF: predicated region fallthrough
CT: control target
= control target key end

     0   :  { %11 = vsyncpa [#allocation3], 0  ;;  %s953_s0 = inlined_call_operand.hbm [shape: f32[8,128], index: 0, kind: input, shape index: {}]   ;;  %s954_s1 = inlined_call_operand.hbm [shape: f32[8,256], index: 1, kind: input, shape index: {}]   ;;  %s955_s2 = inlined_call_operand.hbm [shape: f32[256,512], index: 2, kind: input, shape index: {}]   ;;  %s956_s3 = inlined_call_operand.vmem [shape: f32[1,512], index: 3, kind: input, shape index: {}]   ;;  %s957_s4 = inlined_call_operand.hbm [shape: f32[128,128], index: 4, kind: input, shape index: {}]   ;;  %s958_s5 = inlined_call_operand.vmem [shape: f32[1,128], index: 5, kind: input, shape index: {}]   ;;  %s959_s6 = inlined_call_operand.hbm [shape: f32[8,128], index: 6, kind: output, shape index: {}]  }
   0x1   :  { %12 = vsyncpa [#allocation6], 0 }
   0x2   :  { %13 = vsyncpa [#allocation9], 0 }
   0x3   :  { %14 = vsyncpa [#allocation4], 0  ;;  %s840_s21 = smov [#allocation5]   ;;  %s841_s23 = smov [#allocation2]  }
   0x4   :  { %s31_s22 = sshll.u32 %s840_s21, 4  ;;  %s21_s24 = sshll.u32 %s841_s23, 4  ;;  %s32_s22 = int_to_ptr.vmem [resolvable:$true] %s31_s22  ;;  %s22_s24 = int_to_ptr.vmem [resolvable:$true] %s21_s24 }
   0x5   :  { %s722_s27 = scalar_lea.hbm %s954_s1, 256 }
   0x6   :  { %p723_p0 = scmp.ne.s32.totalorder %s954_s1, %s722_s27  ;;  %p726_p1 = scmp.lt.u32.totalorder %s722_s27, %s954_s1 }
   0x8   :  { %p728_p2 = pnand %p726_p1, %p723_p0 }
   0xa   :  { %731 = shalt.err (!%p728_p2)
}
   0xb   :  { %s732_s8 = scalar_lea.vmem %s32_s22, 256  ;;  %p737_p4 = scmp.lt.s32.totalorder %s32_s22, %s32_s22 }
   0xc   :  { %p733_p3 = scmp.ne.s32.totalorder %s32_s22, %s732_s8  ;;  %p738_p5 = scmp.lt.s32.totalorder %s732_s8, %s732_s8 }
   0xe   :  { %p739_p6 = por %p738_p5, %p737_p4 }
  0x10   :  { %p740_p7 = pnand %p739_p6, %p733_p3 }
  0x12   :  { %743 = shalt.err (!%p740_p7)
}
  0x13   :  { %34 = dma.hbm_to_vmem [thread:$0]  %s954_s1, 256, %s32_s22, [#allocation6]  }
  0x14   :  { %s744_s13 = scalar_lea.hbm %s953_s0, 128 }
  0x15   :  { %p745_p8 = scmp.ne.s32.totalorder %s953_s0, %s744_s13  ;;  %p748_p9 = scmp.lt.u32.totalorder %s744_s13, %s953_s0 }
  0x17   :  { %p750_p10 = pnand %p748_p9, %p745_p8 }
  0x19   :  { %753 = shalt.err (!%p750_p10)
}
  0x1a   :  { %s754_s18 = scalar_lea.vmem %s22_s24, 128  ;;  %p759_p12 = scmp.lt.s32.totalorder %s22_s24, %s22_s24 }
  0x1b   :  { %p755_p11 = scmp.ne.s32.totalorder %s22_s24, %s754_s18  ;;  %p760_p13 = scmp.lt.s32.totalorder %s754_s18, %s754_s18 }
  0x1d   :  { %p761_p0 = por %p760_p13, %p759_p12 }
  0x1f   :  { %p762_p1 = pnand %p761_p0, %p755_p11 }
  0x21   :  { %765 = shalt.err (!%p762_p1)
}
  0x22   :  { %24 = dma.hbm_to_vmem [thread:$0]  %s953_s0, 128, %s22_s24, [#allocation3]  }
  0x23   :  { %s842_s20 = smov [#allocation7]   ;;  %s766_s25 = scalar_lea.hbm %s955_s2, 16384 }
  0x24   :  { %s40_s21 = sshll.u32 %s842_s20, 4  ;;  %p767_p2 = scmp.ne.s32.totalorder %s955_s2, %s766_s25  ;;  %s41_s21 = int_to_ptr.vmem [resolvable:$true] %s40_s21 }
  0x25   :  { %p770_p3 = scmp.lt.u32.totalorder %s766_s25, %s955_s2 }
  0x27   :  { %p772_p4 = pnand %p770_p3, %p767_p2 }
  0x29   :  { %775 = shalt.err (!%p772_p4)
}
  0x2a   :  { %s776_s30 = scalar_lea.vmem %s41_s21, 16384  ;;  %p781_p6 = scmp.lt.s32.totalorder %s41_s21, %s41_s21 }
  0x2b   :  { %p777_p5 = scmp.ne.s32.totalorder %s41_s21, %s776_s30  ;;  %p782_p7 = scmp.lt.s32.totalorder %s776_s30, %s776_s30 }
  0x2d   :  { %p783_p8 = por %p782_p7, %p781_p6 }
  0x2f   :  { %p784_p9 = pnand %p783_p8, %p777_p5 }
  0x31   :  { %787 = shalt.err (!%p784_p9)
}
  0x32   :  { %s843_s0 = smov 512   ;;  %s844_s24 = smov 32  }
  0x33   :  { %46 = dma.hbm_to_vmem [thread:$0]  %s955_s2, 16384, %s41_s21, [#allocation6], %s843_s0, %s843_s0, %s844_s24  }
  0x34   :  { %s845_s9 = smov [#allocation8]   ;;  %s788_s13 = scalar_lea.hbm %s957_s4, 2048 }
  0x35   :  { %s54_s10 = sshll.u32 %s845_s9, 4  ;;  %p789_p10 = scmp.ne.s32.totalorder %s957_s4, %s788_s13  ;;  %s55_s10 = int_to_ptr.vmem [resolvable:$true] %s54_s10 }
  0x36   :  { %p792_p11 = scmp.lt.u32.totalorder %s788_s13, %s957_s4 }
  0x38   :  { %p794_p12 = pnand %p792_p11, %p789_p10 }
  0x3a   :  { %797 = shalt.err (!%p794_p12)
}
  0x3b   :  { %s798_s18 = scalar_lea.vmem %s55_s10, 2048  ;;  %p803_p0 = scmp.lt.s32.totalorder %s55_s10, %s55_s10 }
  0x3c   :  { %p799_p13 = scmp.ne.s32.totalorder %s55_s10, %s798_s18  ;;  %p804_p1 = scmp.lt.s32.totalorder %s798_s18, %s798_s18 }
  0x3e   :  { %p805_p2 = por %p804_p1, %p803_p0 }
  0x40   :  { %p806_p3 = pnand %p805_p2, %p799_p13 }
  0x42   :  { %809 = shalt.err (!%p806_p3)
}
  0x43   :  { %s846_s2 = smov 128   ;;  %s847_s1 = smov 8  }
  0x44   :  { %60 = dma.hbm_to_vmem [thread:$0]  %s957_s4, 2048, %s55_s10, [#allocation9], %s846_s2, %s846_s2, %s847_s1  }
  0x45   :  { %832 = dma.done.wait [#allocation3], 128  }
  0x46   :  { %833 = vsyncadd [#allocation3], 4294967168 }
  0x47   :  { %834 = dma.done.wait [#allocation6], 16640  }
  0x48   :  { %835 = vsyncadd [#allocation6], 4294950656 }
  0x49   :  { %836 = dma.done.wait [#allocation9], 2048  }
  0x4a   :  { %837 = vsyncadd [#allocation9], 4294965248  ;;  %v79_v0 = vld [vmem:[#allocation7 + $0x8] sm:$0xff]  ;;  %v78_v2 = vld [vmem:[#allocation7] sm:$0xff]  ;;  %vm849_vm0 = vmmov 0   ;;  %s851_s23 = smov [#allocation10]  }
  0x4b   :  { %v83_v1 = vld [vmem:[#allocation7 + $0x28] sm:$0xff]  ;;  %v82_v4 = vld [vmem:[#allocation7 + $0x20] sm:$0xff]  ;;  %v81_v19 = vld [vmem:[#allocation7 + $0x18] sm:$0xff]  ;;  %s485_s25 = sshll.u32 %s851_s23, 4  ;;  %s486_s25 = int_to_ptr.vmem [resolvable:$true] %s485_s25 }
  0x4c   :  { %v550_v3 = vpack.c.bf16 %v83_v1, %v79_v0  ;;  %v87_v5 = vld [vmem:[#allocation7 + $0x48] sm:$0xff]  ;;  %v552_v7 = vpack.c.bf16 %v82_v4, %v78_v2  ;;  %v86_v9 = vld [vmem:[#allocation7 + $0x40] sm:$0xff]  ;;  %v85_v20 = vld [vmem:[#allocation7 + $0x38] sm:$0xff]  ;;  %s810_s26 = scalar_lea.vmem %s486_s25, 128  ;;  %p815_p5 = scmp.lt.s32.totalorder %s486_s25, %s486_s25 }
  0x4d   :  { %v91_v6 = vld [vmem:[#allocation7 + $0x68] sm:$0xff]  ;;  %v90_v10 = vld [vmem:[#allocation7 + $0x60] sm:$0xff]  ;;  %v614_v21 = vpack.c.bf16 %v85_v20, %v81_v19  ;;  %v80_v22 = vld [vmem:[#allocation7 + $0x10] sm:$0xff]  ;;  %p811_p4 = scmp.ne.s32.totalorder %s486_s25, %s810_s26  ;;  %p816_p6 = scmp.lt.s32.totalorder %s810_s26, %s810_s26 }
  0x4e   :  { %v554_v8 = vpack.c.bf16 %v91_v6, %v87_v5  ;;  %v95_v11 = vld [vmem:[#allocation7 + $0x88] sm:$0xff]  ;;  %551 = vmatprep.subr.bf16.mxu0 %v550_v3  ;;  %v556_v13 = vpack.c.bf16 %v90_v10, %v86_v9  ;;  %v94_v15 = vld [vmem:[#allocation7 + $0x80] sm:$0xff]  ;;  %v84_v23 = vld [vmem:[#allocation7 + $0x30] sm:$0xff] }
  0x4f   :  { %v99_v12 = vld [vmem:[#allocation7 + $0xa8] sm:$0xff]  ;;  %553 = vmatpush1.bf16.msra.mxu0 %v552_v7  ;;  %v98_v16 = vld [vmem:[#allocation7 + $0xa0] sm:$0xff]  ;;  %v616_v26 = vpack.c.bf16 %v84_v23, %v80_v22  ;;  %v89_v27 = vld [vmem:[#allocation7 + $0x58] sm:$0xff]  ;;  %615 = vmatprep.subr.bf16.mxu1 %v614_v21  ;;  %p817_p7 = por %p816_p6, %p815_p5 }
  0x50   :  { %555 = vmatprep.subr.bf16.mxu0 %v554_v8  ;;  %v558_v14 = vpack.c.bf16 %v99_v12, %v95_v11  ;;  %v103_v17 = vld [vmem:[#allocation7 + $0xc8] sm:$0xff]  ;;  %v560_v24 = vpack.c.bf16 %v98_v16, %v94_v15  ;;  %v102_v25 = vld [vmem:[#allocation7 + $0xc0] sm:$0xff]  ;;  %v93_v31 = vld [vmem:[#allocation7 + $0x78] sm:$0xff] }
  0x51   :  { %v107_v18 = vld [vmem:[#allocation7 + $0xe8] sm:$0xff]  ;;  %v106_v29 = vld [vmem:[#allocation7 + $0xe0] sm:$0xff]  ;;  %617 = vmatpush1.bf16.msra.mxu1 %v616_v26  ;;  %v618_v33 = vpack.c.bf16 %v93_v31, %v89_v27  ;;  %v88_v34 = vld [vmem:[#allocation7 + $0x50] sm:$0xff]  ;;  %p818_p8 = pnand %p817_p7, %p811_p4 }
  0x52   :  { %v562_v28 = vpack.c.bf16 %v107_v18, %v103_v17  ;;  %v111_v30 = vld [vmem:[#allocation7 + $0x108] sm:$0xff]  ;;  %v92_v35 = vld [vmem:[#allocation7 + $0x70] sm:$0xff]  ;;  %v97_v37 = vld [vmem:[#allocation7 + $0x98] sm:$0xff]  ;;  %v564_v39 = vpack.c.bf16 %v106_v29, %v102_v25 }
  0x53   :  { %557 = vmatpush1.bf16.msra.mxu0 %v556_v13  ;;  %v115_v32 = vld [vmem:[#allocation7 + $0x128] sm:$0xff]  ;;  %v620_v36 = vpack.c.bf16 %v92_v35, %v88_v34  ;;  %v101_v38 = vld [vmem:[#allocation7 + $0xb8] sm:$0xff]  ;;  %v110_v40 = vld [vmem:[#allocation7 + $0x100] sm:$0xff]  ;;  %619 = vmatprep.subr.bf16.mxu1 %v618_v33 }
  0x54   :  { %559 = vmatprep.subr.bf16.mxu0 %v558_v14  ;;  %v622_v41 = vpack.c.bf16 %v101_v38, %v97_v37  ;;  %v96_v42 = vld [vmem:[#allocation7 + $0x90] sm:$0xff]  ;;  %v566_v43 = vpack.c.bf16 %v115_v32, %v111_v30  ;;  %v114_v44 = vld [vmem:[#allocation7 + $0x120] sm:$0xff]  ;;  %v119_v45 = vld [vmem:[#allocation7 + $0x148] sm:$0xff] }
  0x55   :  { %v100_v46 = vld [vmem:[#allocation7 + $0xb0] sm:$0xff]  ;;  %v123_v47 = vld [vmem:[#allocation7 + $0x168] sm:$0xff]  ;;  %621 = vmatpush1.bf16.msra.mxu1 %v620_v36  ;;  %v105_v49 = vld [vmem:[#allocation7 + $0xd8] sm:$0xff]  ;;  %v568_v54 = vpack.c.bf16 %v114_v44, %v110_v40 }
  0x56   :  { %v624_v48 = vpack.c.bf16 %v100_v46, %v96_v42  ;;  %v109_v50 = vld [vmem:[#allocation7 + $0xf8] sm:$0xff]  ;;  %623 = vmatprep.subr.bf16.mxu1 %v622_v41  ;;  %v104_v52 = vld [vmem:[#allocation7 + $0xd0] sm:$0xff]  ;;  %v570_v56 = vpack.c.bf16 %v123_v47, %v119_v45  ;;  %v118_v57 = vld [vmem:[#allocation7 + $0x140] sm:$0xff] }
  0x57   :  { %561 = vmatpush1.bf16.msra.mxu0 %v560_v24  ;;  %v626_v51 = vpack.c.bf16 %v109_v50, %v105_v49  ;;  %v108_v53 = vld [vmem:[#allocation7 + $0xf0] sm:$0xff]  ;;  %v113_v55 = vld [vmem:[#allocation7 + $0x118] sm:$0xff]  ;;  %v122_v58 = vld [vmem:[#allocation7 + $0x160] sm:$0xff] }
  0x58   :  { %563 = vmatprep.subr.bf16.mxu0 %v562_v28  ;;  %v117_v59 = vld [vmem:[#allocation7 + $0x138] sm:$0xff]  ;;  %v127_v60 = vld [vmem:[#allocation7 + $0x188] sm:$0xff]  ;;  %v628_v62 = vpack.c.bf16 %v108_v53, %v104_v52  ;;  %v112_v0 = vld [vmem:[#allocation7 + $0x110] sm:$0xff]  ;;  %v572_v2 = vpack.c.bf16 %v122_v58, %v118_v57 }
  0x59   :  { %v131_v61 = vld [vmem:[#allocation7 + $0x1a8] sm:$0xff]  ;;  %625 = vmatpush1.bf16.msra.mxu1 %v624_v48  ;;  %v630_v63 = vpack.c.bf16 %v117_v59, %v113_v55  ;;  %v116_v1 = vld [vmem:[#allocation7 + $0x130] sm:$0xff]  ;;  %v121_v3 = vld [vmem:[#allocation7 + $0x158] sm:$0xff] }
  0x5a   :  { %627 = vmatprep.subr.bf16.mxu1 %v626_v51  ;;  %v125_v4 = vld [vmem:[#allocation7 + $0x178] sm:$0xff]  ;;  %v574_v5 = vpack.c.bf16 %v131_v61, %v127_v60  ;;  %v126_v6 = vld [vmem:[#allocation7 + $0x180] sm:$0xff]  ;;  %v135_v8 = vld [vmem:[#allocation7 + $0x1c8] sm:$0xff]  ;;  %v632_v10 = vpack.c.bf16 %v116_v1, %v112_v0 }
  0x5b   :  { %565 = vmatpush1.bf16.msra.mxu0 %v564_v39  ;;  %v130_v7 = vld [vmem:[#allocation7 + $0x1a0] sm:$0xff]  ;;  %v139_v9 = vld [vmem:[#allocation7 + $0x1e8] sm:$0xff]  ;;  %v634_v11 = vpack.c.bf16 %v125_v4, %v121_v3  ;;  %v120_v12 = vld [vmem:[#allocation7 + $0x150] sm:$0xff] }
  0x5c   :  { %567 = vmatprep.subr.bf16.mxu0 %v566_v43  ;;  %v124_v13 = vld [vmem:[#allocation7 + $0x170] sm:$0xff]  ;;  %v576_v14 = vpack.c.bf16 %v130_v7, %v126_v6  ;;  %v129_v15 = vld [vmem:[#allocation7 + $0x198] sm:$0xff]  ;;  %v578_v17 = vpack.c.bf16 %v139_v9, %v135_v8  ;;  %v134_v18 = vld [vmem:[#allocation7 + $0x1c0] sm:$0xff] }
  0x5d   :  { %629 = vmatpush1.bf16.msra.mxu1 %v628_v62  ;;  %v133_v16 = vld [vmem:[#allocation7 + $0x1b8] sm:$0xff]  ;;  %v138_v19 = vld [vmem:[#allocation7 + $0x1e0] sm:$0xff]  ;;  %v143_v20 = vld [vmem:[#allocation7 + $0x208] sm:$0xff]  ;;  %v636_v22 = vpack.c.bf16 %v124_v13, %v120_v12 }
  0x5e   :  { %631 = vmatprep.subr.bf16.mxu1 %v630_v63  ;;  %v147_v21 = vld [vmem:[#allocation7 + $0x228] sm:$0xff]  ;;  %v638_v23 = vpack.c.bf16 %v133_v16, %v129_v15  ;;  %v128_v24 = vld [vmem:[#allocation7 + $0x190] sm:$0xff]  ;;  %v580_v26 = vpack.c.bf16 %v138_v19, %v134_v18  ;;  %v137_v27 = vld [vmem:[#allocation7 + $0x1d8] sm:$0xff] }
  0x5f   :  { %569 = vmatpush1.bf16.msra.mxu0 %v568_v54  ;;  %v132_v25 = vld [vmem:[#allocation7 + $0x1b0] sm:$0xff]  ;;  %v141_v28 = vld [vmem:[#allocation7 + $0x1f8] sm:$0xff]  ;;  %v582_v29 = vpack.c.bf16 %v147_v21, %v143_v20  ;;  %v142_v30 = vld [vmem:[#allocation7 + $0x200] sm:$0xff] }
  0x60   :  { %571 = vmatprep.subr.bf16.mxu0 %v570_v56  ;;  %v146_v31 = vld [vmem:[#allocation7 + $0x220] sm:$0xff]  ;;  %v151_v32 = vld [vmem:[#allocation7 + $0x248] sm:$0xff]  ;;  %v640_v34 = vpack.c.bf16 %v132_v25, %v128_v24  ;;  %v642_v35 = vpack.c.bf16 %v141_v28, %v137_v27  ;;  %v136_v36 = vld [vmem:[#allocation7 + $0x1d0] sm:$0xff] }
  0x61   :  { %633 = vmatpush1.bf16.msra.mxu1 %v632_v10  ;;  %v155_v33 = vld [vmem:[#allocation7 + $0x268] sm:$0xff]  ;;  %v140_v37 = vld [vmem:[#allocation7 + $0x1f0] sm:$0xff]  ;;  %v584_v38 = vpack.c.bf16 %v146_v31, %v142_v30  ;;  %v145_v39 = vld [vmem:[#allocation7 + $0x218] sm:$0xff] }
  0x62   :  { %635 = vmatprep.subr.bf16.mxu1 %v634_v11  ;;  %v149_v40 = vld [vmem:[#allocation7 + $0x238] sm:$0xff]  ;;  %v586_v41 = vpack.c.bf16 %v155_v33, %v151_v32  ;;  %v150_v42 = vld [vmem:[#allocation7 + $0x240] sm:$0xff]  ;;  %v159_v44 = vld [vmem:[#allocation7 + $0x288] sm:$0xff]  ;;  %v644_v46 = vpack.c.bf16 %v140_v37, %v136_v36 }
  0x63   :  { %573 = vmatpush1.bf16.msra.mxu0 %v572_v2  ;;  %v154_v43 = vld [vmem:[#allocation7 + $0x260] sm:$0xff]  ;;  %v163_v45 = vld [vmem:[#allocation7 + $0x2a8] sm:$0xff]  ;;  %v646_v47 = vpack.c.bf16 %v149_v40, %v145_v39  ;;  %v144_v48 = vld [vmem:[#allocation7 + $0x210] sm:$0xff] }
  0x64   :  { %575 = vmatprep.subr.bf16.mxu0 %v574_v5  ;;  %v148_v49 = vld [vmem:[#allocation7 + $0x230] sm:$0xff]  ;;  %v588_v50 = vpack.c.bf16 %v154_v43, %v150_v42  ;;  %v153_v51 = vld [vmem:[#allocation7 + $0x258] sm:$0xff]  ;;  %v590_v53 = vpack.c.bf16 %v163_v45, %v159_v44  ;;  %v158_v54 = vld [vmem:[#allocation7 + $0x280] sm:$0xff] }
  0x65   :  { %637 = vmatpush1.bf16.msra.mxu1 %v636_v22  ;;  %v157_v52 = vld [vmem:[#allocation7 + $0x278] sm:$0xff]  ;;  %v162_v55 = vld [vmem:[#allocation7 + $0x2a0] sm:$0xff]  ;;  %v167_v57 = vld [vmem:[#allocation7 + $0x2c8] sm:$0xff]  ;;  %v648_v59 = vpack.c.bf16 %v148_v49, %v144_v48 }
  0x66   :  { %639 = vmatprep.subr.bf16.mxu1 %v638_v23  ;;  %v76_v56 = vld [vmem:[#allocation5 + $0x8] sm:$0xff]  ;;  %v171_v58 = vld [vmem:[#allocation7 + $0x2e8] sm:$0xff]  ;;  %v650_v60 = vpack.c.bf16 %v157_v52, %v153_v51  ;;  %v152_v61 = vld [vmem:[#allocation7 + $0x250] sm:$0xff]  ;;  %v592_v63 = vpack.c.bf16 %v162_v55, %v158_v54 }
  0x67   :  { %577 = vmatpush1.bf16.msra.mxu0 %v576_v14  ;;  %292 = vmatprep.mubr.f32.mxu0 %v76_v56  ;;  %v156_v62 = vld [vmem:[#allocation7 + $0x270] sm:$0xff]  ;;  %v161_v0 = vld [vmem:[#allocation7 + $0x298] sm:$0xff]  ;;  %v594_v2 = vpack.c.bf16 %v171_v58, %v167_v57  ;;  %v166_v3 = vld [vmem:[#allocation7 + $0x2c0] sm:$0xff] }
  0x68   :  { %579 = vmatprep.subr.bf16.mxu0 %v578_v17  ;;  %363 = vmatprep.mubr.f32.mxu1 %v76_v56  ;;  %v165_v1 = vld [vmem:[#allocation7 + $0x2b8] sm:$0xff]  ;;  %v170_v4 = vld [vmem:[#allocation7 + $0x2e0] sm:$0xff]  ;;  %v175_v5 = vld [vmem:[#allocation7 + $0x308] sm:$0xff]  ;;  %v652_v7 = vpack.c.bf16 %v156_v62, %v152_v61 }
  0x69   :  { %641 = vmatpush1.bf16.msra.mxu1 %v640_v34  ;;  %v179_v6 = vld [vmem:[#allocation7 + $0x328] sm:$0xff]  ;;  %v654_v8 = vpack.c.bf16 %v165_v1, %v161_v0  ;;  %v160_v9 = vld [vmem:[#allocation7 + $0x290] sm:$0xff]  ;;  %v596_v11 = vpack.c.bf16 %v170_v4, %v166_v3  ;;  %v169_v12 = vld [vmem:[#allocation7 + $0x2d8] sm:$0xff]  ;;  %v848_v4 = vmov 0.0|0.0  }
  0x6a   :  { %643 = vmatprep.subr.bf16.mxu1 %v642_v35  ;;  %v164_v10 = vld [vmem:[#allocation7 + $0x2b0] sm:$0xff]  ;;  %v173_v13 = vld [vmem:[#allocation7 + $0x2f8] sm:$0xff]  ;;  %v598_v14 = vpack.c.bf16 %v179_v6, %v175_v5  ;;  %v174_v15 = vld [vmem:[#allocation7 + $0x300] sm:$0xff] }
  0x6b   :  { %581 = vmatpush1.bf16.msra.mxu0 %v580_v26  ;;  %v178_v16 = vld [vmem:[#allocation7 + $0x320] sm:$0xff]  ;;  %v183_v17 = vld [vmem:[#allocation7 + $0x348] sm:$0xff]  ;;  %v656_v19 = vpack.c.bf16 %v164_v10, %v160_v9  ;;  %v658_v20 = vpack.c.bf16 %v173_v13, %v169_v12  ;;  %v168_v21 = vld [vmem:[#allocation7 + $0x2d0] sm:$0xff] }
  0x6c   :  { %583 = vmatprep.subr.bf16.mxu0 %v582_v29  ;;  %v187_v18 = vld [vmem:[#allocation7 + $0x368] sm:$0xff]  ;;  %v172_v22 = vld [vmem:[#allocation7 + $0x2f0] sm:$0xff]  ;;  %v600_v23 = vpack.c.bf16 %v178_v16, %v174_v15  ;;  %v177_v24 = vld [vmem:[#allocation7 + $0x318] sm:$0xff] }
  0x6d   :  { %645 = vmatpush1.bf16.msra.mxu1 %v644_v46  ;;  %v181_v25 = vld [vmem:[#allocation7 + $0x338] sm:$0xff]  ;;  %v602_v26 = vpack.c.bf16 %v187_v18, %v183_v17  ;;  %v182_v27 = vld [vmem:[#allocation7 + $0x340] sm:$0xff]  ;;  %v191_v29 = vld [vmem:[#allocation7 + $0x388] sm:$0xff]  ;;  %v660_v31 = vpack.c.bf16 %v172_v22, %v168_v21 }
  0x6e   :  { %647 = vmatprep.subr.bf16.mxu1 %v646_v47  ;;  %v186_v28 = vld [vmem:[#allocation7 + $0x360] sm:$0xff]  ;;  %v195_v30 = vld [vmem:[#allocation7 + $0x3a8] sm:$0xff]  ;;  %v662_v32 = vpack.c.bf16 %v181_v25, %v177_v24  ;;  %v176_v33 = vld [vmem:[#allocation7 + $0x310] sm:$0xff] }
  0x6f   :  { %585 = vmatpush1.bf16.msra.mxu0 %v584_v38  ;;  %v180_v34 = vld [vmem:[#allocation7 + $0x330] sm:$0xff]  ;;  %v604_v35 = vpack.c.bf16 %v186_v28, %v182_v27  ;;  %v185_v36 = vld [vmem:[#allocation7 + $0x358] sm:$0xff]  ;;  %v606_v38 = vpack.c.bf16 %v195_v30, %v191_v29  ;;  %v190_v39 = vld [vmem:[#allocation7 + $0x380] sm:$0xff]  ;;  %v850_v27 = vmov 0.0   ;;  %v208_v28 = vlaneseq }
  0x70   :  { %587 = vmatprep.subr.bf16.mxu0 %v586_v41  ;;  %v189_v37 = vld [vmem:[#allocation7 + $0x378] sm:$0xff]  ;;  %v194_v40 = vld [vmem:[#allocation7 + $0x3a0] sm:$0xff]  ;;  %v199_v41 = vld [vmem:[#allocation7 + $0x3c8] sm:$0xff]  ;;  %v664_v43 = vpack.c.bf16 %v180_v34, %v176_v33 }
  0x71   :  { %649 = vmatpush1.bf16.msra.mxu1 %v648_v59  ;;  %v203_v42 = vld [vmem:[#allocation7 + $0x3e8] sm:$0xff]  ;;  %v666_v44 = vpack.c.bf16 %v189_v37, %v185_v36  ;;  %v184_v45 = vld [vmem:[#allocation7 + $0x350] sm:$0xff]  ;;  %v608_v47 = vpack.c.bf16 %v194_v40, %v190_v39  ;;  %v193_v48 = vld [vmem:[#allocation7 + $0x398] sm:$0xff]  ;;  %v209_v29 = vshrl.u32 %v208_v28, 7 }
  0x72   :  { %651 = vmatprep.subr.bf16.mxu1 %v650_v60  ;;  %v188_v46 = vld [vmem:[#allocation7 + $0x370] sm:$0xff]  ;;  %v197_v49 = vld [vmem:[#allocation7 + $0x3b8] sm:$0xff]  ;;  %v198_v51 = vld [vmem:[#allocation7 + $0x3c0] sm:$0xff] }
  0x73   :  { %589 = vmatpush1.bf16.msra.mxu0 %v588_v50  ;;  %v610_v50 = vpack.c.bf16 %v203_v42, %v199_v41  ;;  %v202_v52 = vld [vmem:[#allocation7 + $0x3e0] sm:$0xff]  ;;  %v670_v54 = vpack.c.bf16 %v197_v49, %v193_v48  ;;  %v192_v55 = vld [vmem:[#allocation7 + $0x390] sm:$0xff]  ;;  %v201_v58 = vld [vmem:[#allocation7 + $0x3d8] sm:$0xff]  ;;  %v210_v30 = vsub.s32 0, %v209_v29  ;;  %v218_v41 = vsub.s32 2, %v209_v29 }
  0x74   :  { %591 = vmatprep.subr.bf16.mxu0 %v590_v53  ;;  %v668_v53 = vpack.c.bf16 %v188_v46, %v184_v45  ;;  %v196_v56 = vld [vmem:[#allocation7 + $0x3b0] sm:$0xff]  ;;  %v612_v57 = vpack.c.bf16 %v202_v52, %v198_v51  ;;  %v205_v59 = vld [vmem:[#allocation7 + $0x3f8] sm:$0xff]  ;;  %v379_v60 = vld [vmem:[#allocation8] sm:$0xff] }
  0x75   :  { %653 = vmatpush1.bf16.msra.mxu1 %v652_v7  ;;  %v380_v61 = vld [vmem:[#allocation8 + $0x8] sm:$0xff]  ;;  %v672_v62 = vpack.c.bf16 %v196_v56, %v192_v55  ;;  %v200_v0 = vld [vmem:[#allocation7 + $0x3d0] sm:$0xff]  ;;  %v382_v6 = vld [vmem:[#allocation8 + $0x18] sm:$0xff]  ;;  %v222_v55 = vsub.s32 3, %v209_v29 }
  0x76   :  { %655 = vmatprep.subr.bf16.mxu1 %v654_v8  ;;  %v204_v1 = vld [vmem:[#allocation7 + $0x3f0] sm:$0xff]  ;;  %v679_v3 = vpack.c.bf16 %v380_v61, %v379_v60  ;;  %v383_v9 = vld [vmem:[#allocation8 + $0x20] sm:$0xff]  ;;  %v384_v10 = vld [vmem:[#allocation8 + $0x28] sm:$0xff] }
  0x77   :  { %593 = vmatpush1.bf16.msra.mxu0 %v592_v63  ;;  %v674_v63 = vpack.c.bf16 %v205_v59, %v201_v58  ;;  %v381_v5 = vld [vmem:[#allocation8 + $0x10] sm:$0xff]  ;;  %v676_v7 = vpack.c.bf16 %v204_v1, %v200_v0  ;;  %v386_v13 = vld [vmem:[#allocation8 + $0x38] sm:$0xff]  ;;  %v387_v15 = vld [vmem:[#allocation8 + $0x40] sm:$0xff] }
  0x78   :  { %595 = vmatprep.subr.bf16.mxu0 %v594_v2  ;;  %v75_v2 = vld [vmem:[#allocation5] sm:$0xff]  ;;  %v682_v8 = vpack.c.bf16 %v382_v6, %v381_v5  ;;  %v388_v16 = vld [vmem:[#allocation8 + $0x48] sm:$0xff]  ;;  %v391_v21 = vld [vmem:[#allocation8 + $0x60] sm:$0xff] }
  0x79   :  { %657 = vmatpush1.bf16.msra.mxu1 %v656_v19  ;;  %v385_v12 = vld [vmem:[#allocation8 + $0x30] sm:$0xff]  ;;  %v691_v17 = vpack.c.bf16 %v388_v16, %v387_v15  ;;  %v390_v19 = vld [vmem:[#allocation8 + $0x58] sm:$0xff]  ;;  %v392_v22 = vld [vmem:[#allocation8 + $0x68] sm:$0xff] }
  0x7a   :  { %659 = vmatprep.subr.bf16.mxu1 %v658_v20  ;;  %v389_v18 = vld [vmem:[#allocation8 + $0x50] sm:$0xff]  ;;  %v394_v25 = vld [vmem:[#allocation8 + $0x78] sm:$0xff]  ;;  %v497_v51 = vld [vmem:[%s958_s5] ss:$0 sm:$0xff] }
  0x7b   :  { %597 = vmatpush1.bf16.msra.mxu0 %v596_v11  ;;  %v685_v11 = vpack.c.bf16 %v384_v10, %v383_v9  ;;  %v694_v20 = vpack.c.bf16 %v390_v19, %v389_v18  ;;  %v393_v24 = vld [vmem:[#allocation8 + $0x70] sm:$0xff] }
  0x7c   :  { %599 = vmatprep.subr.bf16.mxu0 %v598_v14  ;;  %v688_v14 = vpack.c.bf16 %v386_v13, %v385_v12 }
  0x7d   :  { %661 = vmatpush1.bf16.msra.mxu1 %v660_v31  ;;  %v206_v31 = vld [vmem:[%s956_s3] sm:$0xf] }
  0x7e   :  { %663 = vmatprep.subr.bf16.mxu1 %v662_v32  ;;  %v214_v32 = vsub.s32 1, %v209_v29  ;;  %v211_v33 = vrot.slane %v206_v31, %v210_v30  ;;  %v223_v56 = vrot.slane %v206_v31, %v222_v55 }
  0x7f   :  { %601 = vmatpush1.bf16.msra.mxu0 %v600_v23  ;;  %v697_v23 = vpack.c.bf16 %v392_v22, %v391_v21 }
  0x80   :  { %603 = vmatprep.subr.bf16.mxu0 %v602_v26  ;;  %v700_v26 = vpack.c.bf16 %v394_v25, %v393_v24  ;;  %v215_v34 = vrot.slane %v206_v31, %v214_v32 }
  0x81   :  { %665 = vmatpush1.bf16.msra.mxu1 %v664_v43 }
  0x82   :  { %667 = vmatprep.subr.bf16.mxu1 %v666_v44  ;;  %v219_v44 = vrot.slane %v206_v31, %v218_v41 }
  0x83   :  { %605 = vmatpush1.bf16.msra.mxu0 %v604_v35 }
  0x84   :  { %607 = vmatprep.subr.bf16.mxu0 %v606_v38 }
  0x85   :  { %669 = vmatpush1.bf16.msra.mxu1 %v668_v53 }
  0x86   :  { %671 = vmatprep.subr.bf16.mxu1 %v670_v54 }
  0x87   :  { %609 = vmatpush1.bf16.msra.mxu0 %v608_v47 }
  0x88   :  { %611 = vmatprep.subr.bf16.mxu0 %v610_v50 }
  0x89   :  { %673 = vmatpush1.bf16.msra.mxu1 %v672_v62 }
  0x8a   :  { %675 = vmatprep.subr.bf16.mxu1 %v674_v63 }
  0x8b   :  { %613 = vmatpush1.bf16.msra.mxu0 %v612_v57  ;;  %v77_v57 = vld [vmem:[#allocation2] sm:$0xff] }
  0x8c   :  { %678 = vmatprep.subr.bf16.mxu0 %v848_v4 }
  0x8d   :  { %677 = vmatpush1.bf16.msra.mxu1 %v676_v7 }
  0x8e   :  { %293 = vmatmul.mubr.f32.vlgmr.msra.gmra.mrb[0].mxu0 %v75_v2 }
  0x8f   :  { %680 = vmatpush3.bf16.msra.mxu0 %v679_v3  ;;  %547 = vmatprep.mubr.msk.f32.mxu0 %vm849_vm0, %v850_v27 }
  0x90   :  { %681 = vmatprep.subr.bf16.mxu0 %v848_v4  ;;  %364 = vmatmul.mubr.f32.vlgmr.msra.gmra.mrb[0].mxu1 %v75_v2 }
  0x93   :  { %683 = vmatpush3.bf16.msra.mxu0 %v682_v8 }
  0x94   :  { %684 = vmatprep.subr.bf16.mxu0 %v848_v4 }
  0x97   :  { %686 = vmatpush3.bf16.msra.mxu0 %v685_v11 }
  0x98   :  { %687 = vmatprep.subr.bf16.mxu0 %v848_v4 }
  0x9b   :  { %689 = vmatpush3.bf16.msra.mxu0 %v688_v14 }
  0x9c   :  { %690 = vmatprep.subr.bf16.mxu0 %v848_v4 }
  0x9f   :  { %692 = vmatpush3.bf16.msra.mxu0 %v691_v17 }
  0xa0   :  { %693 = vmatprep.subr.bf16.mxu0 %v848_v4 }
  0xa3   :  { %695 = vmatpush3.bf16.msra.mxu0 %v694_v20 }
  0xa4   :  { %696 = vmatprep.subr.bf16.mxu0 %v848_v4 }
  0xa7   :  { %698 = vmatpush3.bf16.msra.mxu0 %v697_v23 }
  0xa8   :  { %699 = vmatprep.subr.bf16.mxu0 %v848_v4 }
  0xab   :  { %701 = vmatpush3.bf16.msra.mxu0 %v700_v26 }
 0x161   :  { %v294_v35 = vpop.f32.mrb[0].mxu0 }
 0x162   :  { %v295_v36 = vadd.f32 %v294_v35, %v211_v33  ;;  %v296_v37 = vpop.f32.mrb[1].mxu0 }
 0x163   :  { %v297_v38 = vadd.f32 %v296_v37, %v215_v34  ;;  %v365_v42 = vpop.f32.mrb[0].mxu1 }
 0x164   :  { %v370_v39 = vmax.f32 %v295_v36, 0.0  ;;  %v367_v43 = vpop.f32.mrb[1].mxu1  ;;  %v366_v45 = vadd.f32 %v365_v42, %v219_v44 }
 0x165   :  { %v496_v40 = vmul.f32 -1.442695, %v297_v38  ;;  %v368_v59 = vadd.f32 %v367_v43, %v223_v56 }
 0x166   :  { %548 = vmatmul.mubr.f32.vlgmr.msra.gmra.mrb[2].mxu0 %v370_v39 }
 0x167   :  { %714 = vpow2.f32 %v496_v40  ;;  %v378_v62 = vmax.f32 %v368_v59, 0.0 }
 0x168   :  { %716 = vtanh.f32 %v366_v45 }
 0x171   :  { %v715_v46 = vpop.eup %714 }
 0x172   :  { %v374_v47 = vadd.f32 1.0, %v715_v46  ;;  %v717_v48 = vpop.eup %716 }
 0x174   :  { %718 = vrcp.f32 %v374_v47 }
 0x17e   :  { %v719_v49 = vpop.eup %718 }
 0x17f   :  { %v474_v50 = vmul.f32 %v719_v49, %v717_v48 }
 0x239   :  { %v468_v52 = vpop.f32.mrb[2].mxu0 }
 0x23a   :  { %v469_v53 = vadd.f32 %v497_v51, %v468_v52  ;;  %v549_v54 = vpop.f32.mrb[3].mxu0 }
 0x23c   :  { %720 = vtanh.f32 %v469_v53 }
 0x246   :  { %v721_v58 = vpop.eup %720 }
 0x247   :  { %v473_v60 = vmul.f32 %v721_v58, %v77_v57 }
 0x249   :  { %v475_v61 = vadd.f32 %v474_v50, %v473_v60 }
 0x24b   :  { %v476_v63 = vmax.f32 %v475_v61, 0.0 }
 0x24d   :  { %v477_v0 = vadd.f32 %v476_v63, %v378_v62 }
 0x24f   :  { %478 = vst [vmem:[#allocation10] sm:$0xff] %v477_v0 }
 0x250   :  { %821 = shalt.err (!%p818_p8)
}
 0x251   :  { %s822_s28 = scalar_lea.hbm %s959_s6, 128 }
 0x252   :  { %p823_p9 = scmp.ne.s32.totalorder %s959_s6, %s822_s28  ;;  %p826_p10 = scmp.lt.u32.totalorder %s822_s28, %s959_s6 }
 0x254   :  { %p828_p11 = pnand %p826_p10, %p823_p9 }
 0x256   :  { %831 = shalt.err (!%p828_p11)
}
 0x257   :  { %488 = dma.vmem_to_hbm [thread:$0]  %s486_s25, 128, %s959_s6, [#allocation4]  }
 0x258   :  { %838 = dma.done.wait [#allocation4], 128  }
 0x259   :  { %839 = vsyncadd [#allocation4], 4294967168 }
 0x25a   :  { %492 = vsyncpa [#allocation3], 1 }
 0x25b   :  { %493 = vsyncpa [#allocation6], 1 }
 0x25c   :  { %494 = vsyncpa [#allocation9], 1 }
 0x25d   :  { %495 = vsyncpa [#allocation4], 1 }

</bundles_post_ra>
